<compile_context>
chip_gen: v7x
topology: tpu7x:2x2x1
jax: 0.10.0
libtpu: 0.0.40
codegen_flags: <defaults>
</compile_context>

<pallas_src>
import functools
import math

import jax
import jax.numpy as jnp
from jax.experimental import pallas as pl
from jax.experimental.pallas import tpu as pltpu


# ---------------------------------------------------------------------------
# Hardware queries (best-effort; conservative fallbacks)
# ---------------------------------------------------------------------------
def _vmem_capacity_bytes():
    try:
        info = pltpu.get_tpu_info()
        v = getattr(info, "vmem_capacity_bytes", None)
        if v:
            return int(v)
    except Exception:
        pass
    return 64 << 20  # conservative (v7x per-core VMEM)


def _num_tensorcores():
    try:
        info = pltpu.get_tpu_info()
        for name in ("tensorcores_per_chip", "num_tensorcores", "num_cores",
                     "core_count"):
            v = getattr(info, name, None)
            if isinstance(v, int) and v > 0:
                return v
    except Exception:
        pass
    try:
        kind = jax.devices()[0].device_kind.lower()
        if "v7" in kind or "v4" in kind:
            return 2
    except Exception:
        pass
    return 1  # v5e / v6e: one TensorCore -> never split for parallelism


# ---------------------------------------------------------------------------
# Pallas kernels
# ---------------------------------------------------------------------------
def _weighted_accumulate(x_ref, rw_ref, pooled_ref, *, thw, chunk, ragged):
    """pooled += sum_k  x[:, :, k] * rw[k]   over this chunk of the fused axis.

    x_ref:      (bt, C, chunk)   native dtype (f32 or bf16) chunk of x
    rw_ref:     (1, chunk)       f32 per-element reduction weights
    pooled_ref: (bt, C)          f32 output block, resident across the k axis
    """
    k = pl.program_id(1)

    @pl.when(k == 0)
    def _init():
        pooled_ref[...] = jnp.zeros_like(pooled_ref)

    x = x_ref[...].astype(jnp.float32)            # upcast in-kernel (bf16 wire)
    if ragged:
        # Mask the out-of-bounds tail of the last partial block (its contents
        # are unspecified garbage) instead of padding x in HBM.
        idx = jax.lax.broadcasted_iota(jnp.int32, (1, 1, chunk), 2) + k * chunk
        x = jnp.where(idx < thw, x, 0.0)
    rw = rw_ref[...]                              # (1, chunk)
    pooled_ref[...] += jnp.sum(x * rw[:, None, :], axis=-1)


def _pool_head_kernel(x_ref, rw_ref, pooled_ref, *, thw, chunk, ragged):
    _weighted_accumulate(x_ref, rw_ref, pooled_ref,
                         thw=thw, chunk=chunk, ragged=ragged)


def _fused_head_kernel(x_ref, rw_ref, w_ref, b_ref, pooled_ref, logits_ref, *,
                       thw, chunk, ragged):
    _weighted_accumulate(x_ref, rw_ref, pooled_ref,
                         thw=thw, chunk=chunk, ragged=ragged)

    @pl.when(pl.program_id(1) == pl.num_programs(1) - 1)
    def _finalize():
        logits_ref[...] = (
            jnp.dot(pooled_ref[...], w_ref[...],
                    preferred_element_type=jnp.float32)
            + b_ref[...]
        )


# ---------------------------------------------------------------------------
# Tiling heuristics
# ---------------------------------------------------------------------------
def _choose_bt(B, C, elem_bytes, budget, num_tc):
    """Batch tile: always a multiple of 8 or the full batch dimension."""
    if B <= 8:
        return B  # full-dim block: sublane rule satisfied, small anyway
    divs8 = [d for d in range(8, B + 1, 8) if B % d == 0]
    if not divs8:
        return B  # keep the full batch block (never emit a ragged sublane tile)
    cap = max(8, budget // max(1, C * 128 * elem_bytes))
    fit = [d for d in divs8 if d <= cap]
    bt = max(fit) if fit else divs8[0]
    if num_tc >= 2 and (B // bt) < num_tc:
        smaller = [d for d in divs8 if (B // d) >= num_tc]
        if smaller:
            bt = max(smaller)
        # TODO(synk): for B < 16 on 2-TC chips, a split-K over the fused T*H*W
        # axis (two "parallel" halves + tiny combine) would occupy both
        # TensorCores; not implemented here.
    return bt


def _choose_chunk(thw, bt, C, elem_bytes, budget):
    """Chunk of the fused T*H*W axis: full axis if it fits, else a
    multiple-of-128 chunk (ragged last block masked in-kernel)."""
    bytes_per_unit = bt * C * elem_bytes
    if bytes_per_unit * thw <= budget:
        return thw, 1, False
    max_chunk = max(128, (budget // max(1, bytes_per_unit)) // 128 * 128)
    chunk = None
    if thw % 128 == 0:
        c = min(max_chunk, thw) // 128 * 128
        while c >= 128:
            if thw % c == 0:
                chunk = c
                break
            c -= 128
    if chunk is None:
        chunk = min(max_chunk, ((thw + 127) // 128) * 128)
    n_k = -(-thw // chunk)
    ragged = (n_k * chunk) != thw
    return chunk, n_k, ragged


# ---------------------------------------------------------------------------
# Wrapper (forward of SepConvVisualHead under default settings)
# ---------------------------------------------------------------------------
def sep_conv_visual_head_forward(x_ncthw, params, *, max_block_bytes=None):
    B, C, T, H, W = x_ncthw.shape
    assert T >= 2, "avg_pool3d with temporal kernel 2 requires T >= 2"
    HW = H * W
    THW = T * HW

    # Free view of the native NCTHW layout; keep the input dtype on the wire.
    x = x_ncthw.reshape(B, C, THW)
    if (not jnp.issubdtype(x.dtype, jnp.floating)) or x.dtype == jnp.float64:
        x = x.astype(jnp.float32)
    elem = jnp.dtype(x.dtype).itemsize

    cls_num = params["gloss_w"].shape[0]
    cls_pad = ((cls_num + 127) // 128) * 128

    vmem_cap = _vmem_capacity_bytes()
    num_tc = _num_tensorcores()

    # Fuse the classifier GEMM only when its (double-buffered) weights are a
    # small fraction of VMEM.
    weight_vmem = 2 * (C * cls_pad + cls_pad) * 4
    fuse_gemm = weight_vmem <= min(vmem_cap // 8, 8 << 20)

    reserve = (weight_vmem if fuse_gemm else 0) + (4 << 20)
    input_budget = max(4 << 20, (vmem_cap - reserve) // 4)  # single-buffered x
    if max_block_bytes is not None:
        input_budget = min(input_budget, int(max_block_bytes))

    bt = _choose_bt(B, C, elem, input_budget, num_tc)
    chunk, n_k, ragged = _choose_chunk(THW, bt, C, elem, input_budget)
    n_b = B // bt

    # Reduction weights: 0.5 for the first and last frame, 1.0 otherwise,
    # divided by (T-1)*H*W.  This is exactly
    #   mean_HW -> (f[t]+f[t+1])/2 sliding window -> mean over T-1 windows.
    t_idx = jnp.arange(THW, dtype=jnp.int32) // HW
    edge = (t_idx == 0) | (t_idx == T - 1)
    rw = (jnp.where(edge, 0.5, 1.0) / float((T - 1) * HW)).astype(jnp.float32)
    padded_len = n_k * chunk
    if padded_len > THW:
        rw = jnp.pad(rw, (0, padded_len - THW))   # zero weight on ragged tail
    red_w = rw[None, :]                           # (1, n_k*chunk)

    vmem_est = (2 * bt * C * chunk * elem   # x (double-buffered)
                + 2 * chunk * 4             # reduction weights
                + 2 * bt * C * 4)           # pooled output
    if fuse_gemm:
        vmem_est += weight_vmem + 2 * bt * cls_pad * 4
    vmem_limit = int(min(vmem_cap, max(vmem_est + (2 << 20), 16 << 20)))

    cparams = pltpu.CompilerParams(
        dimension_semantics=("parallel", "arbitrary"),
        vmem_limit_bytes=vmem_limit,
    )

    if fuse_gemm:
        w_t = jnp.pad(params["gloss_w"].T.astype(jnp.float32),
                      ((0, 0), (0, cls_pad - cls_num)))
        bias = jnp.pad(params["gloss_b"].astype(jnp.float32),
                       (0, cls_pad - cls_num))[None, :]
        kernel = functools.partial(_fused_head_kernel,
                                   thw=THW, chunk=chunk, ragged=ragged)
        pooled, logits_pad = pl.pallas_call(
            kernel,
            grid=(n_b, n_k),
            in_specs=[
                pl.BlockSpec((bt, C, chunk), lambda b, k: (b, 0, k)),
                pl.BlockSpec((1, chunk), lambda b, k: (0, k)),
                pl.BlockSpec((C, cls_pad), lambda b, k: (0, 0)),
                pl.BlockSpec((1, cls_pad), lambda b, k: (0, 0)),
            ],
            out_specs=[
                pl.BlockSpec((bt, C), lambda b, k: (b, 0)),
                pl.BlockSpec((bt, cls_pad), lambda b, k: (b, 0)),
            ],
            out_shape=[
                jax.ShapeDtypeStruct((B, C), jnp.float32),
                jax.ShapeDtypeStruct((B, cls_pad), jnp.float32),
            ],
            compiler_params=cparams,
        )(x, red_w, w_t, bias)
        logits = logits_pad[:, :cls_num] if cls_pad != cls_num else logits_pad
    else:
        kernel = functools.partial(_pool_head_kernel,
                                   thw=THW, chunk=chunk, ragged=ragged)
        pooled = pl.pallas_call(
            kernel,
            grid=(n_b, n_k),
            in_specs=[
                pl.BlockSpec((bt, C, chunk), lambda b, k: (b, 0, k)),
                pl.BlockSpec((1, chunk), lambda b, k: (0, k)),
            ],
            out_specs=pl.BlockSpec((bt, C), lambda b, k: (b, 0)),
            out_shape=jax.ShapeDtypeStruct((B, C), jnp.float32),
            compiler_params=cparams,
        )(x, red_w)
        # Tiny (B,C)x(C,cls) GEMM left to XLA -- negligible FLOPs/bytes, and it
        # keeps large vocabularies out of the streaming kernel's VMEM.
        logits = (pooled @ params["gloss_w"].T.astype(jnp.float32)
                  + params["gloss_b"].astype(jnp.float32)[None, :])

    # Matches the PyTorch module's return dict under default settings.
    return {
        "gloss_feature": None,
        "gloss_feature_norm": None,
        "gloss_logits": logits,
        "split_logits": [],
        "bag_logits": [None, None],
        "gloss_probabilities": None,
        "word_fused_gloss_logits": None,
        "word_fused_gloss_probabilities": None,
        "topk_idx": None,
        "cam": None,
        "_vis_fea": pooled,  # exposed for testing (== x.mean(dim=1) in torch)
    }


# ---------------------------------------------------------------------------
# Synthetic params & pure-JAX reference
# ---------------------------------------------------------------------------
def make_params(key, cls_num, input_size, word_emb_dim):
    """Deterministic synthetic parameters with the shapes the module declares."""
    k1, k2, k3, k4, k5, _ = jax.random.split(key, 6)
    bound = 1.0 / math.sqrt(input_size)
    params = {
        # gloss_output_layer: nn.Linear(input_size, cls_num)
        "gloss_w": jax.random.uniform(
            k1, (cls_num, input_size), jnp.float32, -bound, bound),
        "gloss_b": jax.random.uniform(k2, (cls_num,), jnp.float32, -bound, bound),
        # contras_setting='frame' sub-modules (declared in __init__, not used
        # on this forward path; kept for shape fidelity).
        "word_emb_tab": jax.random.normal(k3, (cls_num, word_emb_dim), jnp.float32),
        "word_emb_mapper_w": jax.random.uniform(
            k4, (input_size, word_emb_dim), jnp.float32,
            -1.0 / math.sqrt(word_emb_dim), 1.0 / math.sqrt(word_emb_dim)),
        "word_emb_mapper_b": jax.random.uniform(
            k5, (input_size,), jnp.float32,
            -1.0 / math.sqrt(word_emb_dim), 1.0 / math.sqrt(word_emb_dim)),
    }
    tab_n = params["word_emb_tab"] / jnp.linalg.norm(
        params["word_emb_tab"], axis=-1, keepdims=True)
    params["word_emb_sim"] = tab_n @ tab_n.T
    return params


def reference_forward(x_ncthw, params):
    """Pure-JAX replica of the PyTorch semantics, for verification."""
    win = (x_ncthw[:, :, :-1] + x_ncthw[:, :, 1:]) * 0.5      # 2-frame window
    frames = jnp.mean(win, axis=(3, 4))                       # (B, C, T-1)
    x = jnp.transpose(frames, (0, 2, 1))                      # (B, T-1, C)
    vis_fea = jnp.mean(x, axis=1)                             # (B, C)
    logits = vis_fea @ params["gloss_w"].T + params["gloss_b"]
    return vis_fea, logits


if __name__ == "__main__":
    B, C, T, H, W = 2, 128, 8, 8, 8      # C = input_size
    CLS = 50                             # cls_num
    WORD_EMB_DIM = 16

    key = jax.random.PRNGKey(0)
    kx, kp = jax.random.split(key)
    x = jax.random.normal(kx, (B, C, T, H, W), jnp.float32)   # NCTHW, like PyTorch
    params = make_params(kp, CLS, C, WORD_EMB_DIM)

    # 1) f32 input, fused classifier path.
    out = sep_conv_visual_head_forward(x, params)
    logits = jax.block_until_ready(out["gloss_logits"])
    vis_fea = jax.block_until_ready(out["_vis_fea"])
    ref_vis, ref_logits = reference_forward(x, params)
    assert logits.shape == (B, CLS) and vis_fea.shape == (B, C)
    assert jnp.allclose(vis_fea, ref_vis, atol=1e-5, rtol=1e-5)
    assert jnp.allclose(logits, ref_logits, atol=1e-4, rtol=1e-4)

    # 2) bf16 streaming (native-dtype wire, f32 accumulate inside the kernel).
    x_bf16 = x.astype(jnp.bfloat16)
    out_bf = sep_conv_visual_head_forward(x_bf16, params)
    ref_vis_bf, ref_logits_bf = reference_forward(
        x_bf16.astype(jnp.float32), params)
    assert jnp.allclose(jax.block_until_ready(out_bf["_vis_fea"]),
                        ref_vis_bf, atol=1e-3, rtol=1e-3)
    assert jnp.allclose(jax.block_until_ready(out_bf["gloss_logits"]),
                        ref_logits_bf, atol=1e-3, rtol=1e-3)

    # 3) Ragged T*H*W (7x7 spatial) with a tiny block budget to force
    #    lane-aligned chunking + in-kernel tail masking.
    x2 = jax.random.normal(jax.random.PRNGKey(1), (B, C, 9, 7, 7), jnp.float32)
    out2 = sep_conv_visual_head_forward(x2, params, max_block_bytes=64 << 10)
    ref_vis2, ref_logits2 = reference_forward(x2, params)
    assert jnp.allclose(jax.block_until_ready(out2["_vis_fea"]),
                        ref_vis2, atol=1e-5, rtol=1e-5)
    assert jnp.allclose(jax.block_until_ready(out2["gloss_logits"]),
                        ref_logits2, atol=1e-4, rtol=1e-4)

    print("KERNEL_OK")
</pallas_src>

<mosaic_0001>
module attributes {stable_mosaic.version = 11 : i64} {
  func.func @_fused_head_kernel(%arg0: i32, %arg1: i32, %arg2: memref<2x128x512xf32, #tpu.memory_space<vmem>>, %arg3: memref<1x512xf32, #tpu.memory_space<vmem>>, %arg4: memref<128x128xf32, #tpu.memory_space<vmem>>, %arg5: memref<1x128xf32, #tpu.memory_space<vmem>>, %arg6: memref<2x128xf32, #tpu.memory_space<vmem>>, %arg7: memref<2x128xf32, #tpu.memory_space<vmem>>) attributes {dimension_semantics = [#tpu.dimension_semantics<parallel>, #tpu.dimension_semantics<arbitrary>], iteration_bounds = array<i64: 1, 1>, scalar_prefetch = 0 : i64, scratch_operands = 0 : i64, tpu.core_type = #tpu.core_type<tc>, window_params = [{transform_indices = @transform_0, window_bounds = array<i64: 2, 128, 512>}, {transform_indices = @transform_1, window_bounds = array<i64: 1, 512>}, {pipeline_mode = #tpu.pipeline_mode<synchronous>, transform_indices = @transform_2, window_bounds = array<i64: 128, 128>}, {pipeline_mode = #tpu.pipeline_mode<synchronous>, transform_indices = @transform_3, window_bounds = array<i64: 1, 128>}, {transform_indices = @transform_4, window_bounds = array<i64: 2, 128>}, {transform_indices = @transform_5, window_bounds = array<i64: 2, 128>}]} {
    %c0_i32 = arith.constant 0 : i32
    %0 = arith.cmpi eq, %arg1, %c0_i32 : i32
    %1 = arith.extui %0 : i1 to i32
    %c0_i32_0 = arith.constant 0 : i32
    %2 = arith.cmpi ne, %1, %c0_i32_0 : i32
    scf.if %2 {
      %cst_11 = arith.constant 0.000000e+00 : f32
      %15 = vector.broadcast %cst_11 : f32 to vector<2x128xf32>
      %c0_12 = arith.constant 0 : index
      %c0_13 = arith.constant 0 : index
      %16 = vector.load %arg6[%c0_12, %c0_13] : memref<2x128xf32, #tpu.memory_space<vmem>>, vector<2x128xf32>
      tpu.vector_store %arg6[%c0_12, %c0_13], %15 {strides = array<i32>} : memref<2x128xf32, #tpu.memory_space<vmem>>, vector<2x128xf32>,
    } else {
    }
    %c0 = arith.constant 0 : index
    %c0_1 = arith.constant 0 : index
    %c0_2 = arith.constant 0 : index
    %3 = vector.load %arg2[%c0, %c0_1, %c0_2] : memref<2x128x512xf32, #tpu.memory_space<vmem>>, vector<2x128x512xf32>
    %c0_3 = arith.constant 0 : index
    %c0_4 = arith.constant 0 : index
    %4 = vector.load %arg3[%c0_3, %c0_4] : memref<1x512xf32, #tpu.memory_space<vmem>>, vector<1x512xf32>
    %c0_5 = arith.constant 0 : index
    %c0_6 = arith.constant 0 : index
    %5 = vector.load %arg6[%c0_5, %c0_6] : memref<2x128xf32, #tpu.memory_space<vmem>>, vector<2x128xf32>
    %6 = vector.shape_cast %4 : vector<1x512xf32> to vector<1x1x512xf32>
    %7 = vector.broadcast %6 : vector<1x1x512xf32> to vector<2x128x512xf32>
    %8 = arith.mulf %3, %7 : vector<2x128x512xf32>
    %cst = arith.constant dense<0.000000e+00> : vector<2x128xf32>
    %9 = vector.multi_reduction <add>, %8, %cst [2] : vector<2x128x512xf32> to vector<2x128xf32>
    %10 = arith.addf %5, %9 : vector<2x128xf32>
    %c0_7 = arith.constant 0 : index
    %c0_8 = arith.constant 0 : index
    %11 = vector.load %arg6[%c0_7, %c0_8] : memref<2x128xf32, #tpu.memory_space<vmem>>, vector<2x128xf32>
    tpu.vector_store %arg6[%c0_7, %c0_8], %10 {strides = array<i32>} : memref<2x128xf32, #tpu.memory_space<vmem>>, vector<2x128xf32>,
    %c0_i32_9 = arith.constant 0 : i32
    %12 = arith.cmpi eq, %arg1, %c0_i32_9 : i32
    %13 = arith.extui %12 : i1 to i32
    %c0_i32_10 = arith.constant 0 : i32
    %14 = arith.cmpi ne, %13, %c0_i32_10 : i32
    scf.if %14 {
      %c0_11 = arith.constant 0 : index
      %c0_12 = arith.constant 0 : index
      %15 = vector.load %arg6[%c0_11, %c0_12] : memref<2x128xf32, #tpu.memory_space<vmem>>, vector<2x128xf32>
      %c0_13 = arith.constant 0 : index
      %c0_14 = arith.constant 0 : index
      %16 = vector.load %arg4[%c0_13, %c0_14] : memref<128x128xf32, #tpu.memory_space<vmem>>, vector<128x128xf32>
      %cst_15 = arith.constant dense<0.000000e+00> : vector<2x128xf32>
      %17 = tpu.matmul %15, %16, %cst_15 {dimension_numbers = #tpu.dot_dimension_numbers<[1], [0], [0], [1], [0, 0, 1, 1], [], []>} : vector<2x128xf32>, vector<128x128xf32>, vector<2x128xf32> -> vector<2x128xf32>
      %c0_16 = arith.constant 0 : index
      %c0_17 = arith.constant 0 : index
      %18 = vector.load %arg5[%c0_16, %c0_17] : memref<1x128xf32, #tpu.memory_space<vmem>>, vector<1x128xf32>
      %19 = vector.broadcast %18 : vector<1x128xf32> to vector<2x128xf32>
      %20 = arith.addf %17, %19 : vector<2x128xf32>
      %c0_18 = arith.constant 0 : index
      %c0_19 = arith.constant 0 : index
      %21 = vector.load %arg7[%c0_18, %c0_19] : memref<2x128xf32, #tpu.memory_space<vmem>>, vector<2x128xf32>
      tpu.vector_store %arg7[%c0_18, %c0_19], %20 {strides = array<i32>} : memref<2x128xf32, #tpu.memory_space<vmem>>, vector<2x128xf32>,
    } else {
    }
    return
  }
  func.func @transform_0(%arg0: i32, %arg1: i32) -> (i32, i32, i32) {
    %c0_i32 = arith.constant 0 : i32
    %c0_i32_0 = arith.constant 0 : i32
    return %arg0, %c0_i32, %arg1 : i32, i32, i32
  }
  func.func @transform_1(%arg0: i32, %arg1: i32) -> (i32, i32) {
    %c0_i32 = arith.constant 0 : i32
    %c0_i32_0 = arith.constant 0 : i32
    return %c0_i32, %arg1 : i32, i32
  }
  func.func @transform_2(%arg0: i32, %arg1: i32) -> (i32, i32) {
    %c0_i32 = arith.constant 0 : i32
    %c0_i32_0 = arith.constant 0 : i32
    %c0_i32_1 = arith.constant 0 : i32
    return %c0_i32, %c0_i32_0 : i32, i32
  }
  func.func @transform_3(%arg0: i32, %arg1: i32) -> (i32, i32) {
    %c0_i32 = arith.constant 0 : i32
    %c0_i32_0 = arith.constant 0 : i32
    %c0_i32_1 = arith.constant 0 : i32
    return %c0_i32, %c0_i32_0 : i32, i32
  }
  func.func @transform_4(%arg0: i32, %arg1: i32) -> (i32, i32) {
    %c0_i32 = arith.constant 0 : i32
    %c0_i32_0 = arith.constant 0 : i32
    return %arg0, %c0_i32 : i32, i32
  }
  func.func @transform_5(%arg0: i32, %arg1: i32) -> (i32, i32) {
    %c0_i32 = arith.constant 0 : i32
    %c0_i32_0 = arith.constant 0 : i32
    return %arg0, %c0_i32 : i32, i32
  }
}

</mosaic_0001>

<bundles_post_ra>
// kernel: tpu_custom_call.1
= control target key start
LH: loop header
LB: loop body
LE: loop exit
PB: predicated region body
PF: predicated region fallthrough
CT: control target
= control target key end

     0   :  { %11 = vsyncpa [#allocation3], 0  ;;  %s1468_s0 = inlined_call_operand.hbm [shape: f32[2,128,512], index: 0, kind: input, shape index: {}]   ;;  %s1469_s1 = inlined_call_operand.hbm [shape: f32[1,512], index: 1, kind: input, shape index: {}]   ;;  %s1470_s2 = inlined_call_operand.hbm [shape: f32[128,128], index: 2, kind: input, shape index: {}]   ;;  %s1471_s3 = inlined_call_operand.vmem [shape: f32[1,128], index: 3, kind: input, shape index: {}]   ;;  %s1472_s4 = inlined_call_operand.hbm [shape: f32[2,128], index: 4, kind: output, shape index: {0}]   ;;  %s1473_s5 = inlined_call_operand.hbm [shape: f32[2,128], index: 5, kind: output, shape index: {1}]  }
   0x1   :  { %12 = vsyncpa [#allocation6], 0 }
   0x2   :  { %13 = vsyncpa [#allocation4], 0 }
   0x3   :  { %14 = vsyncpa [#allocation10], 0  ;;  %s1066_s18 = smov [#allocation5]   ;;  %s1067_s20 = smov [#allocation2]  }
   0x4   :  { %s33_s19 = sshll.u32 %s1066_s18, 4  ;;  %s20_s21 = sshll.u32 %s1067_s20, 4  ;;  %s34_s19 = int_to_ptr.vmem [resolvable:$true] %s33_s19  ;;  %s1108_s21 = int_to_ptr.vmem [resolvable:$true] %s20_s21 }
   0x5   :  { %s948_s24 = scalar_lea.hbm %s1469_s1, 64 }
   0x6   :  { %p949_p0 = scmp.ne.s32.totalorder %s1469_s1, %s948_s24  ;;  %p952_p1 = scmp.lt.u32.totalorder %s948_s24, %s1469_s1 }
   0x8   :  { %p954_p2 = pnand %p952_p1, %p949_p0 }
   0xa   :  { %957 = shalt.err (!%p954_p2)
}
   0xb   :  { %s958_s29 = scalar_lea.vmem %s34_s19, 64  ;;  %p963_p4 = scmp.lt.s32.totalorder %s34_s19, %s34_s19 }
   0xc   :  { %p959_p3 = scmp.ne.s32.totalorder %s34_s19, %s958_s29  ;;  %p964_p5 = scmp.lt.s32.totalorder %s958_s29, %s958_s29 }
   0xe   :  { %p965_p6 = por %p964_p5, %p963_p4 }
  0x10   :  { %p966_p7 = pnand %p965_p6, %p959_p3 }
  0x12   :  { %969 = shalt.err (!%p966_p7)
}
  0x13   :  { %36 = dma.hbm_to_vmem [thread:$0]  %s1469_s1, 64, %s34_s19, [#allocation6]  }
  0x14   :  { %s970_s9 = scalar_lea.hbm %s1468_s0, 16384 }
  0x15   :  { %p971_p8 = scmp.ne.s32.totalorder %s1468_s0, %s970_s9  ;;  %p974_p9 = scmp.lt.u32.totalorder %s970_s9, %s1468_s0 }
  0x17   :  { %p976_p10 = pnand %p974_p9, %p971_p8 }
  0x19   :  { %979 = shalt.err (!%p976_p10)
}
  0x1a   :  { %s980_s14 = scalar_lea.vmem %s1108_s21, 16384  ;;  %p985_p12 = scmp.lt.s32.totalorder %s1108_s21, %s1108_s21 }
  0x1b   :  { %p981_p11 = scmp.ne.s32.totalorder %s1108_s21, %s980_s14  ;;  %p986_p13 = scmp.lt.s32.totalorder %s980_s14, %s980_s14 }
  0x1d   :  { %p987_p0 = por %p986_p13, %p985_p12 }
  0x1f   :  { %p988_p1 = pnand %p987_p0, %p981_p11 }
  0x21   :  { %991 = shalt.err (!%p988_p1)
}
  0x22   :  { %s1068_s1 = smov 512   ;;  %s1069_s15 = smov 32  }
  0x23   :  { %26 = dma.hbm_to_vmem [thread:$0]  %s1468_s0, 16384, %s1108_s21, [#allocation3], %s1068_s1, %s1068_s1, %s1069_s15  }
  0x24   :  { %s1070_s18 = smov [#allocation7]   ;;  %s992_s23 = scalar_lea.hbm %s1470_s2, 2048 }
  0x25   :  { %s42_s19 = sshll.u32 %s1070_s18, 4  ;;  %p993_p2 = scmp.ne.s32.totalorder %s1470_s2, %s992_s23  ;;  %s43_s19 = int_to_ptr.vmem [resolvable:$true] %s42_s19 }
  0x26   :  { %p996_p3 = scmp.lt.u32.totalorder %s992_s23, %s1470_s2 }
  0x28   :  { %p998_p4 = pnand %p996_p3, %p993_p2 }
  0x2a   :  { %1001 = shalt.err (!%p998_p4)
}
  0x2b   :  { %s1002_s28 = scalar_lea.vmem %s43_s19, 2048  ;;  %p1007_p6 = scmp.lt.s32.totalorder %s43_s19, %s43_s19 }
  0x2c   :  { %p1003_p5 = scmp.ne.s32.totalorder %s43_s19, %s1002_s28  ;;  %p1008_p7 = scmp.lt.s32.totalorder %s1002_s28, %s1002_s28 }
  0x2e   :  { %p1009_p8 = por %p1008_p7, %p1007_p6 }
  0x30   :  { %p1010_p9 = pnand %p1009_p8, %p1003_p5 }
  0x32   :  { %1013 = shalt.err (!%p1010_p9)
}
  0x33   :  { %s1071_s0 = smov 128   ;;  %s1072_s21 = smov 8  }
  0x34   :  { %48 = dma.hbm_to_vmem [thread:$0]  %s1470_s2, 2048, %s43_s19, [#allocation6], %s1071_s0, %s1071_s0, %s1072_s21  }
  0x35   :  { %1058 = dma.done.wait [#allocation3], 16384  }
  0x36   :  { %1059 = vsyncadd [#allocation3], 4294950912 }
  0x37   :  { %1060 = dma.done.wait [#allocation6], 2112  }
  0x38   :  { %1061 = vsyncadd [#allocation6], 4294965184  ;;  %v196_v0 = vlaneseq  ;;  %v129_v6 = vld [vmem:[#allocation2 + $0x200] sm:$0xff]  ;;  %v130_v7 = vld [vmem:[#allocation2 + $0x208] sm:$0xff]  ;;  %vm1075_vm0 = vmmov 0   ;;  %vm547_vm1 = vcmask 130112  }
  0x39   :  { %v131_v8 = vld [vmem:[#allocation2 + $0x210] sm:$0xff]  ;;  %v132_v9 = vld [vmem:[#allocation2 + $0x218] sm:$0xff]  ;;  %v193_v10 = vld [vmem:[#allocation5] sm:$0xf]  ;;  %vm554_vm2 = vcmask 195712   ;;  %vm561_vm3 = vcmask 261312  }
  0x3a   :  { %v1152_v1 = vshrl.u32 %v196_v0, 7  ;;  %v65_v11 = vld [vmem:[#allocation2] sm:$0xff]  ;;  %v66_v16 = vld [vmem:[#allocation2 + $0x8] sm:$0xff]  ;;  %v67_v17 = vld [vmem:[#allocation2 + $0x10] sm:$0xff]  ;;  %vm568_vm4 = vcmask 326912   ;;  %vm575_vm5 = vcmask 392512  }
  0x3b   :  { %v68_v18 = vld [vmem:[#allocation2 + $0x18] sm:$0xff]  ;;  %v133_v19 = vld [vmem:[#allocation2 + $0x220] sm:$0xff]  ;;  %v134_v20 = vld [vmem:[#allocation2 + $0x228] sm:$0xff]  ;;  %vm582_vm6 = vcmask 458112   ;;  %vm589_vm7 = vcmask 523712   ;;  %vm596_vm8 = vcmask 589312  }
  0x3c   :  { %v198_v2 = vsub.s32 0, %v1152_v1  ;;  %v202_v3 = vsub.s32 1, %v1152_v1  ;;  %v206_v4 = vsub.s32 2, %v1152_v1  ;;  %v210_v5 = vsub.s32 3, %v1152_v1  ;;  %v135_v21 = vld [vmem:[#allocation2 + $0x230] sm:$0xff]  ;;  %v136_v26 = vld [vmem:[#allocation2 + $0x238] sm:$0xff] }
  0x3d   :  { %v69_v27 = vld [vmem:[#allocation2 + $0x20] sm:$0xff]  ;;  %v70_v28 = vld [vmem:[#allocation2 + $0x28] sm:$0xff]  ;;  %v71_v33 = vld [vmem:[#allocation2 + $0x30] sm:$0xff]  ;;  %vm603_vm9 = vcmask 654912   ;;  %vm610_vm10 = vcmask 720512   ;;  %vm617_vm11 = vcmask 786112  }
  0x3e   :  { %v1158_v12 = vrot.slane %v193_v10, %v198_v2  ;;  %v1160_v13 = vrot.slane %v193_v10, %v202_v3  ;;  %v1162_v14 = vrot.slane %v193_v10, %v206_v4  ;;  %v1164_v15 = vrot.slane %v193_v10, %v210_v5  ;;  %v72_v34 = vld [vmem:[#allocation2 + $0x38] sm:$0xff]  ;;  %v137_v39 = vld [vmem:[#allocation2 + $0x240] sm:$0xff]  ;;  %v138_v40 = vld [vmem:[#allocation2 + $0x248] sm:$0xff]  ;;  %s1076_s2 = smov [#allocation8]  }
  0x3f   :  { %v139_v45 = vld [vmem:[#allocation2 + $0x250] sm:$0xff]  ;;  %v73_v50 = vld [vmem:[#allocation2 + $0x40] sm:$0xff]  ;;  %v140_v53 = vld [vmem:[#allocation2 + $0x258] sm:$0xff]  ;;  %vm624_vm12 = vcmask 851712   ;;  %vm631_vm13 = vcmask 917312   ;;  %vm638_vm14 = vcmask 982912  }
  0x40   :  { %v280_v22 = vmul.f32 %v1158_v12, %v129_v6  ;;  %v281_v23 = vmul.f32 %v1160_v13, %v130_v7  ;;  %v282_v24 = vmul.f32 %v1162_v14, %v131_v8  ;;  %v283_v25 = vmul.f32 %v1164_v15, %v132_v9  ;;  %v74_v56 = vld [vmem:[#allocation2 + $0x48] sm:$0xff]  ;;  %v75_v57 = vld [vmem:[#allocation2 + $0x50] sm:$0xff]  ;;  %v141_v61 = vld [vmem:[#allocation2 + $0x260] sm:$0xff]  ;;  %s835_s6 = sshll.u32 %s1076_s2, 4  ;;  %s836_s6 = int_to_ptr.vmem [resolvable:$true] %s835_s6 }
  0x41   :  { %v216_v29 = vmul.f32 %v1158_v12, %v65_v11  ;;  %v217_v30 = vmul.f32 %v1160_v13, %v66_v16  ;;  %v218_v31 = vmul.f32 %v1162_v14, %v67_v17  ;;  %v219_v32 = vmul.f32 %v1164_v15, %v68_v18  ;;  %v142_v62 = vld [vmem:[#allocation2 + $0x268] sm:$0xff]  ;;  %v76_v4 = vld [vmem:[#allocation2 + $0x58] sm:$0xff]  ;;  %v143_v6 = vld [vmem:[#allocation2 + $0x270] sm:$0xff]  ;;  %s1014_s7 = scalar_lea.vmem %s836_s6, 32  ;;  %p1019_p11 = scmp.lt.s32.totalorder %s836_s6, %s836_s6 }
  0x42   :  { %v424_v35 = vadd.f32 %v281_v23, %v280_v22  ;;  %v284_v36 = vmul.f32 %v1158_v12, %v133_v19  ;;  %v285_v37 = vmul.f32 %v1160_v13, %v134_v20  ;;  %v286_v38 = vmul.f32 %v1162_v14, %v135_v21  ;;  %v77_v7 = vld [vmem:[#allocation2 + $0x60] sm:$0xff]  ;;  %v144_v16 = vld [vmem:[#allocation2 + $0x278] sm:$0xff]  ;;  %v78_v17 = vld [vmem:[#allocation2 + $0x68] sm:$0xff]  ;;  %p1015_p10 = scmp.ne.s32.totalorder %s836_s6, %s1014_s7  ;;  %p1020_p12 = scmp.lt.s32.totalorder %s1014_s7, %s1014_s7 }
  0x43   :  { %v344_v41 = vadd.f32 %v217_v30, %v216_v29  ;;  %v287_v42 = vmul.f32 %v1164_v15, %v136_v26  ;;  %v220_v43 = vmul.f32 %v1158_v12, %v69_v27  ;;  %v221_v44 = vmul.f32 %v1160_v13, %v70_v28  ;;  %v79_v18 = vld [vmem:[#allocation2 + $0x70] sm:$0xff]  ;;  %v145_v23 = vld [vmem:[#allocation2 + $0x280] sm:$0xff]  ;;  %v80_v28 = vld [vmem:[#allocation2 + $0x78] sm:$0xff] }
  0x44   :  { %v425_v46 = vadd.f32 %v424_v35, %v282_v24  ;;  %v429_v47 = vadd.f32 %v285_v37, %v284_v36  ;;  %v222_v48 = vmul.f32 %v1162_v14, %v71_v33  ;;  %v223_v49 = vmul.f32 %v1164_v15, %v72_v34  ;;  %v146_v24 = vld [vmem:[#allocation2 + $0x288] sm:$0xff]  ;;  %v147_v30 = vld [vmem:[#allocation2 + $0x290] sm:$0xff]  ;;  %v81_v35 = vld [vmem:[#allocation2 + $0x80] sm:$0xff]  ;;  %p1021_p13 = por %p1020_p12, %p1019_p11 }
  0x45   :  { %v345_v51 = vadd.f32 %v344_v41, %v218_v31  ;;  %v349_v52 = vadd.f32 %v221_v44, %v220_v43  ;;  %v288_v54 = vmul.f32 %v1158_v12, %v137_v39  ;;  %v289_v55 = vmul.f32 %v1160_v13, %v138_v40  ;;  %v82_v36 = vld [vmem:[#allocation2 + $0x88] sm:$0xff]  ;;  %v148_v39 = vld [vmem:[#allocation2 + $0x298] sm:$0xff] }
  0x46   :  { %v426_v58 = vadd.f32 %v425_v46, %v283_v25  ;;  %v430_v59 = vadd.f32 %v429_v47, %v286_v38  ;;  %v290_v60 = vmul.f32 %v1162_v14, %v139_v45  ;;  %v224_v5 = vmul.f32 %v1158_v12, %v73_v50  ;;  %v149_v47 = vld [vmem:[#allocation2 + $0x2a0] sm:$0xff]  ;;  %p1022_p0 = pnand %p1021_p13, %p1015_p10 }
  0x47   :  { %v346_v63 = vadd.f32 %v345_v51, %v219_v32  ;;  %v350_v2 = vadd.f32 %v349_v52, %v222_v48  ;;  %v434_v3 = vadd.f32 %v289_v55, %v288_v54  ;;  %v291_v9 = vmul.f32 %v1164_v15, %v140_v53  ;;  %v150_v48 = vld [vmem:[#allocation2 + $0x2a8] sm:$0xff]  ;;  %v84_v51 = vld [vmem:[#allocation2 + $0x98] sm:$0xff]  ;;  %v151_v54 = vld [vmem:[#allocation2 + $0x2b0] sm:$0xff] }
  0x48   :  { %427 = vadd.xlane.f32.xlu1 %v426_v58  ;;  %v431_v8 = vadd.f32 %v430_v59, %v287_v42  ;;  %v225_v10 = vmul.f32 %v1160_v13, %v74_v56  ;;  %v226_v11 = vmul.f32 %v1162_v14, %v75_v57  ;;  %v292_v21 = vmul.f32 %v1158_v12, %v141_v61  ;;  %v83_v42 = vld [vmem:[#allocation2 + $0x90] sm:$0xff]  ;;  %v85_v55 = vld [vmem:[#allocation2 + $0xa0] sm:$0xff]  ;;  %v86_v61 = vld [vmem:[#allocation2 + $0xa8] sm:$0xff] }
  0x49   :  { %347 = vadd.xlane.f32.xlu0 %v346_v63  ;;  %v351_v19 = vadd.f32 %v350_v2, %v223_v49  ;;  %v435_v20 = vadd.f32 %v434_v3, %v290_v60  ;;  %v293_v22 = vmul.f32 %v1160_v13, %v142_v62  ;;  %v227_v25 = vmul.f32 %v1164_v15, %v76_v4  ;;  %v152_v60 = vld [vmem:[#allocation2 + $0x2b8] sm:$0xff]  ;;  %v87_v4 = vld [vmem:[#allocation2 + $0xb0] sm:$0xff] }
  0x4a   :  { %v354_v26 = vadd.f32 %v225_v10, %v224_v5  ;;  %v294_v27 = vmul.f32 %v1162_v14, %v143_v6  ;;  %v228_v29 = vmul.f32 %v1158_v12, %v77_v7  ;;  %v295_v31 = vmul.f32 %v1164_v15, %v144_v16  ;;  %v153_v5 = vld [vmem:[#allocation2 + $0x2c0] sm:$0xff]  ;;  %v154_v6 = vld [vmem:[#allocation2 + $0x2c8] sm:$0xff]  ;;  %v88_v10 = vld [vmem:[#allocation2 + $0xb8] sm:$0xff] }
  0x4b   :  { %v439_v32 = vadd.f32 %v293_v22, %v292_v21  ;;  %v229_v33 = vmul.f32 %v1160_v13, %v78_v17  ;;  %v230_v34 = vmul.f32 %v1162_v14, %v79_v18  ;;  %v436_v37 = vadd.f32 %v435_v20, %v291_v9  ;;  %v155_v16 = vld [vmem:[#allocation2 + $0x2d0] sm:$0xff]  ;;  %v89_v21 = vld [vmem:[#allocation2 + $0xc0] sm:$0xff]  ;;  %v90_v22 = vld [vmem:[#allocation2 + $0xc8] sm:$0xff] }
  0x4c   :  { %432 = vadd.xlane.f32.xlu1 %v431_v8  ;;  %v355_v38 = vadd.f32 %v354_v26, %v226_v11  ;;  %v296_v40 = vmul.f32 %v1158_v12, %v145_v23  ;;  %v297_v41 = vmul.f32 %v1160_v13, %v146_v24  ;;  %v231_v44 = vmul.f32 %v1164_v15, %v80_v28  ;;  %v91_v28 = vld [vmem:[#allocation2 + $0xd0] sm:$0xff] }
  0x4d   :  { %352 = vadd.xlane.f32.xlu0 %v351_v19  ;;  %v440_v43 = vadd.f32 %v439_v32, %v294_v27  ;;  %v359_v45 = vadd.f32 %v229_v33, %v228_v29  ;;  %v298_v46 = vmul.f32 %v1162_v14, %v147_v30  ;;  %v232_v52 = vmul.f32 %v1158_v12, %v81_v35  ;;  %v157_v33 = vld [vmem:[#allocation2 + $0x2e0] sm:$0xff] }
  0x4e   :  { %v356_v49 = vadd.f32 %v355_v38, %v227_v25  ;;  %v444_v50 = vadd.f32 %v297_v41, %v296_v40  ;;  %v233_v53 = vmul.f32 %v1160_v13, %v82_v36  ;;  %v299_v58 = vmul.f32 %v1164_v15, %v148_v39  ;;  %v156_v25 = vld [vmem:[#allocation2 + $0x2d8] sm:$0xff]  ;;  %v159_v40 = vld [vmem:[#allocation2 + $0x2f0] sm:$0xff]  ;;  %v93_v41 = vld [vmem:[#allocation2 + $0xe0] sm:$0xff] }
  0x4f   :  { %v441_v56 = vadd.f32 %v440_v43, %v295_v31  ;;  %v360_v57 = vadd.f32 %v359_v45, %v230_v34  ;;  %v234_v59 = vmul.f32 %v1162_v14, %v83_v42  ;;  %v300_v2 = vmul.f32 %v1158_v12, %v149_v47  ;;  %v158_v34 = vld [vmem:[#allocation2 + $0x2e8] sm:$0xff] }
  0x50   :  { %437 = vadd.xlane.f32.xlu1 %v436_v37  ;;  %v445_v62 = vadd.f32 %v444_v50, %v298_v46  ;;  %v364_v63 = vadd.f32 %v233_v53, %v232_v52  ;;  %v301_v3 = vmul.f32 %v1160_v13, %v150_v48  ;;  %v235_v8 = vmul.f32 %v1164_v15, %v84_v51  ;;  %v92_v37 = vld [vmem:[#allocation2 + $0xd8] sm:$0xff]  ;;  %v94_v45 = vld [vmem:[#allocation2 + $0xe8] sm:$0xff]  ;;  %v95_v50 = vld [vmem:[#allocation2 + $0xf0] sm:$0xff] }
  0x51   :  { %357 = vadd.xlane.f32.xlu0 %v356_v49  ;;  %v361_v7 = vadd.f32 %v360_v57, %v231_v44  ;;  %v302_v9 = vmul.f32 %v1162_v14, %v151_v54  ;;  %v236_v11 = vmul.f32 %v1158_v12, %v85_v55  ;;  %v303_v18 = vmul.f32 %v1164_v15, %v152_v60  ;;  %v161_v51 = vld [vmem:[#allocation2 + $0x300] sm:$0xff]  ;;  %v162_v52 = vld [vmem:[#allocation2 + $0x308] sm:$0xff]  ;;  %v160_v55 = vld [vmem:[#allocation2 + $0x2f8] sm:$0xff] }
  0x52   :  { %v365_v17 = vadd.f32 %v364_v63, %v234_v59  ;;  %v449_v19 = vadd.f32 %v301_v3, %v300_v2  ;;  %v237_v20 = vmul.f32 %v1160_v13, %v86_v61  ;;  %v446_v23 = vadd.f32 %v445_v62, %v299_v58  ;;  %v163_v62 = vld [vmem:[#allocation2 + $0x310] sm:$0xff]  ;;  %v97_v63 = vld [vmem:[#allocation2 + $0x100] sm:$0xff]  ;;  %v98_v2 = vld [vmem:[#allocation2 + $0x108] sm:$0xff] }
  0x53   :  { %v238_v24 = vmul.f32 %v1162_v14, %v87_v4  ;;  %v304_v26 = vmul.f32 %v1158_v12, %v153_v5  ;;  %v305_v27 = vmul.f32 %v1160_v13, %v154_v6  ;;  %v239_v30 = vmul.f32 %v1164_v15, %v88_v10  ;;  %v96_v3 = vld [vmem:[#allocation2 + $0xf8] sm:$0xff] }
  0x54   :  { %442 = vadd.xlane.f32.xlu1 %v441_v56  ;;  %v450_v29 = vadd.f32 %v449_v19, %v302_v9  ;;  %v369_v31 = vadd.f32 %v237_v20, %v236_v11  ;;  %v306_v32 = vmul.f32 %v1162_v14, %v155_v16  ;;  %v366_v35 = vadd.f32 %v365_v17, %v235_v8  ;;  %v164_v16 = vld [vmem:[#allocation2 + $0x318] sm:$0xff]  ;;  %v165_v17 = vld [vmem:[#allocation2 + $0x320] sm:$0xff] }
  0x55   :  { %362 = vadd.xlane.f32.xlu0 %v361_v7  ;;  %v454_v36 = vadd.f32 %v305_v27, %v304_v26  ;;  %v240_v38 = vmul.f32 %v1158_v12, %v89_v21  ;;  %v241_v39 = vmul.f32 %v1160_v13, %v90_v22  ;;  %v307_v43 = vmul.f32 %v1164_v15, %v156_v25  ;;  %v99_v7 = vld [vmem:[#allocation2 + $0x110] sm:$0xff]  ;;  %v100_v21 = vld [vmem:[#allocation2 + $0x118] sm:$0xff]  ;;  %v101_v25 = vld [vmem:[#allocation2 + $0x120] sm:$0xff] }
  0x56   :  { %v370_v42 = vadd.f32 %v369_v31, %v238_v24  ;;  %v242_v44 = vmul.f32 %v1162_v14, %v91_v28  ;;  %v308_v48 = vmul.f32 %v1158_v12, %v157_v33  ;;  %v309_v49 = vmul.f32 %v1160_v13, %v158_v34  ;;  %v167_v24 = vld [vmem:[#allocation2 + $0x330] sm:$0xff] }
  0x57   :  { %v455_v46 = vadd.f32 %v454_v36, %v306_v32  ;;  %v374_v47 = vadd.f32 %v241_v39, %v240_v38  ;;  %v451_v53 = vadd.f32 %v450_v29, %v303_v18  ;;  %v243_v54 = vmul.f32 %v1164_v15, %v92_v37  ;;  %v166_v18 = vld [vmem:[#allocation2 + $0x328] sm:$0xff]  ;;  %v169_v36 = vld [vmem:[#allocation2 + $0x340] sm:$0xff] }
  0x58   :  { %447 = vadd.xlane.f32.xlu1 %v446_v23  ;;  %v310_v56 = vmul.f32 %v1162_v14, %v159_v40  ;;  %v244_v57 = vmul.f32 %v1158_v12, %v93_v41  ;;  %v371_v58 = vadd.f32 %v370_v42, %v239_v30  ;;  %v459_v60 = vadd.f32 %v309_v49, %v308_v48  ;;  %v102_v30 = vld [vmem:[#allocation2 + $0x128] sm:$0xff]  ;;  %v168_v40 = vld [vmem:[#allocation2 + $0x338] sm:$0xff]  ;;  %v105_v48 = vld [vmem:[#allocation2 + $0x140] sm:$0xff] }
  0x59   :  { %367 = vadd.xlane.f32.xlu0 %v366_v35  ;;  %v375_v59 = vadd.f32 %v374_v47, %v242_v44  ;;  %v245_v61 = vmul.f32 %v1160_v13, %v94_v45  ;;  %v246_v4 = vmul.f32 %v1162_v14, %v95_v50  ;;  %v312_v5 = vmul.f32 %v1158_v12, %v161_v51  ;;  %v103_v35 = vld [vmem:[#allocation2 + $0x130] sm:$0xff]  ;;  %v170_v37 = vld [vmem:[#allocation2 + $0x348] sm:$0xff]  ;;  %v104_v51 = vld [vmem:[#allocation2 + $0x138] sm:$0xff] }
  0x5a   :  { %v313_v6 = vmul.f32 %v1160_v13, %v162_v52  ;;  %v456_v8 = vadd.f32 %v455_v46, %v307_v43  ;;  %v311_v9 = vmul.f32 %v1164_v15, %v160_v55  ;;  %v460_v10 = vadd.f32 %v459_v60, %v310_v56  ;;  %v171_v47 = vld [vmem:[#allocation2 + $0x350] sm:$0xff]  ;;  %v106_v49 = vld [vmem:[#allocation2 + $0x148] sm:$0xff] }
  0x5b   :  { %v379_v11 = vadd.f32 %v245_v61, %v244_v57  ;;  %v314_v19 = vmul.f32 %v1162_v14, %v163_v62  ;;  %v248_v22 = vmul.f32 %v1158_v12, %v97_v63  ;;  %v249_v23 = vmul.f32 %v1160_v13, %v98_v2  ;;  %v174_v60 = vld [vmem:[#allocation2 + $0x368] sm:$0xff]  ;;  %v172_v61 = vld [vmem:[#allocation2 + $0x358] sm:$0xff] }
  0x5c   :  { %452 = vadd.xlane.f32.xlu1 %v451_v53  ;;  %v464_v20 = vadd.f32 %v313_v6, %v312_v5  ;;  %v376_v26 = vadd.f32 %v375_v59, %v243_v54  ;;  %v247_v27 = vmul.f32 %v1164_v15, %v96_v3  ;;  %v250_v29 = vmul.f32 %v1162_v14, %v99_v7  ;;  %v173_v59 = vld [vmem:[#allocation2 + $0x360] sm:$0xff] }
  0x5d   :  { %372 = vadd.xlane.f32.xlu0 %v371_v58  ;;  %v380_v28 = vadd.f32 %v379_v11, %v246_v4  ;;  %v315_v31 = vmul.f32 %v1164_v15, %v164_v16  ;;  %v384_v32 = vadd.f32 %v249_v23, %v248_v22  ;;  %v316_v33 = vmul.f32 %v1158_v12, %v165_v17  ;;  %v107_v58 = vld [vmem:[#allocation2 + $0x150] sm:$0xff]  ;;  %v109_v5 = vld [vmem:[#allocation2 + $0x160] sm:$0xff]  ;;  %v110_v11 = vld [vmem:[#allocation2 + $0x168] sm:$0xff] }
  0x5e   :  { %v317_v34 = vmul.f32 %v1160_v13, %v166_v18  ;;  %v461_v38 = vadd.f32 %v460_v10, %v311_v9  ;;  %v251_v39 = vmul.f32 %v1164_v15, %v100_v21  ;;  %v318_v41 = vmul.f32 %v1162_v14, %v167_v24  ;;  %v175_v4 = vld [vmem:[#allocation2 + $0x370] sm:$0xff]  ;;  %v108_v10 = vld [vmem:[#allocation2 + $0x158] sm:$0xff]  ;;  %v177_v21 = vld [vmem:[#allocation2 + $0x380] sm:$0xff] }
  0x5f   :  { %v252_v42 = vmul.f32 %v1158_v12, %v101_v25  ;;  %v465_v43 = vadd.f32 %v464_v20, %v314_v19  ;;  %v385_v44 = vadd.f32 %v384_v32, %v250_v29  ;;  %v253_v46 = vmul.f32 %v1160_v13, %v102_v30  ;;  %v176_v18 = vld [vmem:[#allocation2 + $0x378] sm:$0xff]  ;;  %v178_v22 = vld [vmem:[#allocation2 + $0x388] sm:$0xff]  ;;  %v179_v32 = vld [vmem:[#allocation2 + $0x390] sm:$0xff] }
  0x60   :  { %457 = vadd.xlane.f32.xlu1 %v456_v8  ;;  %v469_v45 = vadd.f32 %v317_v34, %v316_v33  ;;  %v381_v50 = vadd.f32 %v380_v28, %v247_v27  ;;  %v254_v52 = vmul.f32 %v1162_v14, %v103_v35  ;;  %v320_v53 = vmul.f32 %v1158_v12, %v169_v36  ;;  %v113_v33 = vld [vmem:[#allocation2 + $0x180] sm:$0xff]  ;;  %v114_v34 = vld [vmem:[#allocation2 + $0x188] sm:$0xff] }
  0x61   :  { %377 = vadd.xlane.f32.xlu0 %v376_v26  ;;  %v321_v54 = vmul.f32 %v1160_v13, %v170_v37  ;;  %v319_v55 = vmul.f32 %v1164_v15, %v168_v40  ;;  %v389_v57 = vadd.f32 %v253_v46, %v252_v42  ;;  %v322_v62 = vmul.f32 %v1162_v14, %v171_v47  ;;  %v111_v26 = vld [vmem:[#allocation2 + $0x170] sm:$0xff]  ;;  %v112_v46 = vld [vmem:[#allocation2 + $0x178] sm:$0xff] }
  0x62   :  { %v470_v56 = vadd.f32 %v469_v45, %v318_v41  ;;  %v256_v2 = vmul.f32 %v1158_v12, %v105_v48  ;;  %v257_v3 = vmul.f32 %v1160_v13, %v106_v49  ;;  %v466_v6 = vadd.f32 %v465_v43, %v315_v31  ;;  %v182_v45 = vld [vmem:[#allocation2 + $0x3a8] sm:$0xff] }
  0x63   :  { %v474_v63 = vadd.f32 %v321_v54, %v320_v53  ;;  %v386_v7 = vadd.f32 %v385_v44, %v251_v39  ;;  %v255_v8 = vmul.f32 %v1164_v15, %v104_v51  ;;  %v390_v9 = vadd.f32 %v389_v57, %v254_v52  ;;  %v115_v39 = vld [vmem:[#allocation2 + $0x190] sm:$0xff]  ;;  %v181_v44 = vld [vmem:[#allocation2 + $0x3a0] sm:$0xff]  ;;  %v180_v52 = vld [vmem:[#allocation2 + $0x398] sm:$0xff] }
  0x64   :  { %462 = vadd.xlane.f32.xlu1 %v461_v38  ;;  %v258_v16 = vmul.f32 %v1162_v14, %v107_v58  ;;  %v394_v17 = vadd.f32 %v257_v3, %v256_v2  ;;  %v324_v19 = vmul.f32 %v1158_v12, %v173_v59  ;;  %v325_v20 = vmul.f32 %v1160_v13, %v174_v60  ;;  %v117_v51 = vld [vmem:[#allocation2 + $0x1a0] sm:$0xff]  ;;  %v118_v54 = vld [vmem:[#allocation2 + $0x1a8] sm:$0xff]  ;;  %v183_v58 = vld [vmem:[#allocation2 + $0x3b0] sm:$0xff] }
  0x65   :  { %382 = vadd.xlane.f32.xlu0 %v381_v50  ;;  %v471_v23 = vadd.f32 %v470_v56, %v319_v55  ;;  %v323_v24 = vmul.f32 %v1164_v15, %v172_v61  ;;  %v326_v25 = vmul.f32 %v1162_v14, %v175_v4  ;;  %v260_v27 = vmul.f32 %v1158_v12, %v109_v5  ;;  %v116_v56 = vld [vmem:[#allocation2 + $0x198] sm:$0xff]  ;;  %v119_v2 = vld [vmem:[#allocation2 + $0x1b0] sm:$0xff]  ;;  %v185_v4 = vld [vmem:[#allocation2 + $0x3c0] sm:$0xff] }
  0x66   :  { %v475_v28 = vadd.f32 %v474_v63, %v322_v62  ;;  %v259_v29 = vmul.f32 %v1164_v15, %v108_v10  ;;  %v479_v30 = vadd.f32 %v325_v20, %v324_v19  ;;  %v261_v31 = vmul.f32 %v1160_v13, %v110_v11  ;;  %v186_v5 = vld [vmem:[#allocation2 + $0x3c8] sm:$0xff]  ;;  %v121_v10 = vld [vmem:[#allocation2 + $0x1c0] sm:$0xff] }
  0x67   :  { %v391_v35 = vadd.f32 %v390_v9, %v255_v8  ;;  %v327_v36 = vmul.f32 %v1164_v15, %v176_v18  ;;  %v328_v37 = vmul.f32 %v1158_v12, %v177_v21  ;;  %v329_v38 = vmul.f32 %v1160_v13, %v178_v22  ;;  %v122_v11 = vld [vmem:[#allocation2 + $0x1c8] sm:$0xff]  ;;  %v184_v18 = vld [vmem:[#allocation2 + $0x3b8] sm:$0xff] }
  0x68   :  { %467 = vadd.xlane.f32.xlu1 %v466_v6  ;;  %v395_v40 = vadd.f32 %v394_v17, %v258_v16  ;;  %v480_v41 = vadd.f32 %v479_v30, %v326_v25  ;;  %v262_v42 = vmul.f32 %v1162_v14, %v111_v26  ;;  %v399_v43 = vadd.f32 %v261_v31, %v260_v27  ;;  %v120_v21 = vld [vmem:[#allocation2 + $0x1b8] sm:$0xff]  ;;  %v189_v30 = vld [vmem:[#allocation2 + $0x3e0] sm:$0xff]  ;;  %v190_v31 = vld [vmem:[#allocation2 + $0x3e8] sm:$0xff] }
  0x69   :  { %387 = vadd.xlane.f32.xlu0 %v386_v7  ;;  %v330_v47 = vmul.f32 %v1162_v14, %v179_v32  ;;  %v484_v48 = vadd.f32 %v329_v38, %v328_v37  ;;  %v264_v49 = vmul.f32 %v1158_v12, %v113_v33  ;;  %v265_v50 = vmul.f32 %v1160_v13, %v114_v34  ;;  %v123_v34 = vld [vmem:[#allocation2 + $0x1d0] sm:$0xff] }
  0x6a   :  { %v266_v53 = vmul.f32 %v1162_v14, %v115_v39  ;;  %v476_v55 = vadd.f32 %v475_v28, %v323_v24  ;;  %v332_v59 = vmul.f32 %v1158_v12, %v181_v44  ;;  %v333_v60 = vmul.f32 %v1160_v13, %v182_v45  ;;  %v187_v24 = vld [vmem:[#allocation2 + $0x3d0] sm:$0xff] }
  0x6b   :  { %v404_v57 = vadd.f32 %v265_v50, %v264_v49  ;;  %v396_v61 = vadd.f32 %v395_v40, %v259_v29  ;;  %v263_v62 = vmul.f32 %v1164_v15, %v112_v46  ;;  %v400_v63 = vadd.f32 %v399_v43, %v262_v42  ;;  %v188_v42 = vld [vmem:[#allocation2 + $0x3d8] sm:$0xff]  ;;  %v191_v49 = vld [vmem:[#allocation2 + $0x3f0] sm:$0xff] }
  0x6c   :  { %472 = vadd.xlane.f32.xlu1 %v471_v23  ;;  %v268_v3 = vmul.f32 %v1158_v12, %v117_v51  ;;  %v481_v6 = vadd.f32 %v480_v41, %v327_v36  ;;  %v331_v7 = vmul.f32 %v1164_v15, %v180_v52  ;;  %v485_v8 = vadd.f32 %v484_v48, %v330_v47  ;;  %v126_v36 = vld [vmem:[#allocation2 + $0x1e8] sm:$0xff]  ;;  %v124_v46 = vld [vmem:[#allocation2 + $0x1d8] sm:$0xff]  ;;  %v127_v52 = vld [vmem:[#allocation2 + $0x1f0] sm:$0xff] }
  0x6d   :  { %392 = vadd.xlane.f32.xlu0 %v391_v35  ;;  %v269_v9 = vmul.f32 %v1160_v13, %v118_v54  ;;  %v267_v16 = vmul.f32 %v1164_v15, %v116_v56  ;;  %v405_v17 = vadd.f32 %v404_v57, %v266_v53  ;;  %v334_v19 = vmul.f32 %v1162_v14, %v183_v58  ;;  %v125_v35 = vld [vmem:[#allocation2 + $0x1e0] sm:$0xff] }
  0x6e   :  { %v489_v20 = vadd.f32 %v333_v60, %v332_v59  ;;  %v270_v22 = vmul.f32 %v1162_v14, %v119_v2  ;;  %v336_v25 = vmul.f32 %v1158_v12, %v185_v4  ;;  %v337_v26 = vmul.f32 %v1160_v13, %v186_v5 }
  0x6f   :  { %v409_v23 = vadd.f32 %v269_v9, %v268_v3  ;;  %v401_v27 = vadd.f32 %v400_v63, %v263_v62  ;;  %v272_v28 = vmul.f32 %v1158_v12, %v121_v10  ;;  %v273_v29 = vmul.f32 %v1160_v13, %v122_v11  ;;  %v128_v63 = vld [vmem:[#allocation2 + $0x1f8] sm:$0xff] }
  0x70   :  { %477 = vadd.xlane.f32.xlu1 %v476_v55  ;;  %v486_v32 = vadd.f32 %v485_v8, %v331_v7  ;;  %v335_v33 = vmul.f32 %v1164_v15, %v184_v18  ;;  %v406_v37 = vadd.f32 %v405_v17, %v267_v16  ;;  %v490_v38 = vadd.f32 %v489_v20, %v334_v19  ;;  %v735_v7 = vld [vmem:[#allocation7] sm:$0xff]  ;;  %v736_v8 = vld [vmem:[#allocation7 + $0x8] sm:$0xff]  ;;  %v737_v16 = vld [vmem:[#allocation7 + $0x10] sm:$0xff] }
  0x71   :  { %397 = vadd.xlane.f32.xlu0 %v396_v61  ;;  %v271_v39 = vmul.f32 %v1164_v15, %v120_v21  ;;  %v338_v40 = vmul.f32 %v1162_v14, %v187_v24  ;;  %v410_v41 = vadd.f32 %v409_v23, %v270_v22  ;;  %v494_v43 = vadd.f32 %v337_v26, %v336_v25  ;;  %v192_v61 = vld [vmem:[#allocation2 + $0x3f8] sm:$0xff]  ;;  %v740_v19 = vld [vmem:[#allocation7 + $0x28] sm:$0xff]  ;;  %v743_v24 = vld [vmem:[#allocation7 + $0x40] sm:$0xff] }
  0x72   :  { %v340_v44 = vmul.f32 %v1158_v12, %v189_v30  ;;  %v341_v45 = vmul.f32 %v1160_v13, %v190_v31  ;;  %v274_v47 = vmul.f32 %v1162_v14, %v123_v34  ;;  %v414_v48 = vadd.f32 %v273_v29, %v272_v28  ;;  %v738_v17 = vld [vmem:[#allocation7 + $0x18] sm:$0xff]  ;;  %v741_v21 = vld [vmem:[#allocation7 + $0x30] sm:$0xff]  ;;  %v744_v25 = vld [vmem:[#allocation7 + $0x48] sm:$0xff] }
  0x73   :  { %v276_v50 = vmul.f32 %v1158_v12, %v125_v35  ;;  %v277_v51 = vmul.f32 %v1160_v13, %v126_v36  ;;  %v491_v53 = vadd.f32 %v490_v38, %v335_v33  ;;  %v339_v54 = vmul.f32 %v1164_v15, %v188_v42  ;;  %v742_v22 = vld [vmem:[#allocation7 + $0x38] sm:$0xff]  ;;  %v745_v28 = vld [vmem:[#allocation7 + $0x50] sm:$0xff]  ;;  %v747_v31 = vld [vmem:[#allocation7 + $0x60] sm:$0xff] }
  0x74   :  { %482 = vadd.xlane.f32.xlu1 %v481_v6  ;;  %v495_v55 = vadd.f32 %v494_v43, %v338_v40  ;;  %v275_v56 = vmul.f32 %v1164_v15, %v124_v46  ;;  %v342_v57 = vmul.f32 %v1162_v14, %v191_v49  ;;  %v499_v58 = vadd.f32 %v341_v45, %v340_v44  ;;  %v746_v29 = vld [vmem:[#allocation7 + $0x58] sm:$0xff]  ;;  %v749_v34 = vld [vmem:[#allocation7 + $0x70] sm:$0xff] }
  0x75   :  { %402 = vadd.xlane.f32.xlu0 %v401_v27  ;;  %v411_v59 = vadd.f32 %v410_v41, %v271_v39  ;;  %v415_v60 = vadd.f32 %v414_v48, %v274_v47  ;;  %v278_v62 = vmul.f32 %v1162_v14, %v127_v52  ;;  %v419_v12 = vadd.f32 %v277_v51, %v276_v50  ;;  %v750_v35 = vld [vmem:[#allocation7 + $0x78] sm:$0xff] }
  0x76   :  { %v496_v13 = vadd.f32 %v495_v55, %v339_v54  ;;  %v343_v2 = vmul.f32 %v1164_v15, %v192_v61  ;;  %v500_v3 = vadd.f32 %v499_v58, %v342_v57  ;;  %v279_v5 = vmul.f32 %v1164_v15, %v128_v63  ;;  %v739_v15 = vld [vmem:[#allocation7 + $0x20] sm:$0xff] }
  0x77   :  { %v416_v4 = vadd.f32 %v415_v60, %v275_v56  ;;  %v420_v6 = vadd.f32 %v419_v12, %v278_v62  ;;  %v913_v10 = vpack.c.bf16 %v736_v8, %v735_v7  ;;  %v1073_v14 = vmov 0.0|0.0  }
  0x78   :  { %487 = vadd.xlane.f32.xlu1 %v486_v32  ;;  %v501_v9 = vadd.f32 %v500_v3, %v343_v2  ;;  %912 = vmatprep.subr.bf16.mxu0 %v1073_v14  ;;  %v916_v18 = vpack.c.bf16 %v738_v17, %v737_v16  ;;  %v919_v20 = vpack.c.bf16 %v740_v19, %v739_v15  ;;  %v1074_v26 = vmov 0.0   ;;  %v748_v32 = vld [vmem:[#allocation7 + $0x68] sm:$0xff] }
  0x79   :  { %407 = vadd.xlane.f32.xlu0 %v406_v37  ;;  %v421_v11 = vadd.f32 %v420_v6, %v279_v5  ;;  %914 = vmatpush3.bf16.msra.mxu0 %v913_v10  ;;  %v922_v23 = vpack.c.bf16 %v742_v22, %v741_v21  ;;  %64 = vst [vmem:[#allocation8] sm:$0x3] %v1074_v26  ;;  %v537_v54 = vand.u32 127, %v196_v0  ;;  %vm645_vm15 = vcmask 1048512  }
  0x7a   :  { %915 = vmatprep.subr.bf16.mxu0 %v1073_v14  ;;  %v925_v27 = vpack.c.bf16 %v744_v25, %v743_v24  ;;  %v928_v30 = vpack.c.bf16 %v746_v29, %v745_v28  ;;  %v931_v33 = vpack.c.bf16 %v748_v32, %v747_v31  ;;  %v934_v36 = vpack.c.bf16 %v750_v35, %v749_v34 }
  0x7b   :  { %909 = vmatprep.mubr.msk.f32.mxu0 %vm1075_vm0, %v1074_v26  ;;  %v542_v56 = vadd.s32 4294967288, %v537_v54  ;;  %v549_v58 = vadd.s32 4294967280, %v537_v54  ;;  %v540_v61 = vsub.s32 %v537_v54, %v1152_v1  ;;  %v563_v12 = vadd.s32 4294967264, %v537_v54 }
  0x7c   :  { %492 = vadd.xlane.f32.xlu1 %v491_v53  ;;  %v570_v63 = vadd.s32 4294967256, %v537_v54  ;;  %v584_v0 = vadd.s32 4294967240, %v537_v54  ;;  %v591_v2 = vadd.s32 4294967232, %v537_v54  ;;  %v598_v6 = vadd.s32 4294967224, %v537_v54 }
  0x7d   :  { %412 = vadd.xlane.f32.xlu0 %v411_v59  ;;  %917 = vmatpush3.bf16.msra.mxu0 %v916_v18  ;;  %v556_v59 = vadd.s32 4294967272, %v537_v54  ;;  %v545_v62 = vsub.s32 %v542_v56, %v1152_v1  ;;  %v605_v7 = vadd.s32 4294967216, %v537_v54  ;;  %v619_v10 = vadd.s32 4294967200, %v537_v54 }
  0x7e   :  { %918 = vmatprep.subr.bf16.mxu0 %v1073_v14  ;;  %v626_v16 = vadd.s32 4294967192, %v537_v54  ;;  %v587_v18 = vsub.s32 %v584_v0, %v1152_v1  ;;  %v1348_v15 = vsub.s32 %v591_v2, %v1152_v1  ;;  %v1354_v22 = vsub.s32 %v598_v6, %v1152_v1 }
  0x7f   :  { %v559_v5 = vsub.s32 %v556_v59, %v1152_v1  ;;  %v640_v25 = vadd.s32 4294967176, %v537_v54  ;;  %v1367_v29 = vsub.s32 %v619_v10, %v1152_v1  ;;  %vm726_vm0 = vcmask 1041409  }
  0x80   :  { %497 = vadd.xlane.f32.xlu1 %v496_v13  ;;  %v577_v13 = vadd.s32 4294967248, %v537_v54 }
  0x81   :  { %417 = vadd.xlane.f32.xlu0 %v416_v4  ;;  %920 = vmatpush3.bf16.msra.mxu0 %v919_v20  ;;  %v552_v4 = vsub.s32 %v549_v58, %v1152_v1  ;;  %v633_v20 = vadd.s32 4294967184, %v537_v54 }
  0x82   :  { %921 = vmatprep.subr.bf16.mxu0 %v1073_v14  ;;  %v580_v17 = vsub.s32 %v577_v13, %v1152_v1 }
  0x84   :  { %502 = vadd.xlane.f32.xlu1 %v501_v9  ;;  %v612_v9 = vadd.s32 4294967208, %v537_v54  ;;  %v1385_v54 = vsub.s32 %v640_v25, %v1152_v1 }
  0x85   :  { %422 = vadd.xlane.f32.xlu0 %v421_v11  ;;  %923 = vmatpush3.bf16.msra.mxu0 %v922_v23  ;;  %v566_v11 = vsub.s32 %v563_v12, %v1152_v1  ;;  %v1357_v23 = vsub.s32 %v605_v7, %v1152_v1 }
  0x86   :  { %924 = vmatprep.subr.bf16.mxu0 %v1073_v14  ;;  %v1364_v28 = vsub.s32 %v612_v9, %v1152_v1 }
  0x89   :  { %926 = vmatpush3.bf16.msra.mxu0 %v925_v27 }
  0x8a   :  { %927 = vmatprep.subr.bf16.mxu0 %v1073_v14 }
  0x8d   :  { %929 = vmatpush3.bf16.msra.mxu0 %v928_v30 }
  0x8e   :  { %930 = vmatprep.subr.bf16.mxu0 %v1073_v14 }
  0x91   :  { %932 = vmatpush3.bf16.msra.mxu0 %v931_v33  ;;  %v1373_v33 = vsub.s32 %v626_v16, %v1152_v1 }
  0x92   :  { %933 = vmatprep.subr.bf16.mxu0 %v1073_v14  ;;  %v573_v14 = vsub.s32 %v570_v63, %v1152_v1 }
  0x95   :  { %935 = vmatpush3.bf16.msra.mxu0 %v934_v36 }
  0xd5   :  { %v1294_v37 = vpop.xlane.xlu1 %427 }
  0xd6   :  { %v1296_v38 = vpop.xlane.xlu0 %347  ;;  %v650_v30 = vrot.slane %v1294_v37, %v540_v61 }
  0xd7   :  { %v541_v34 = vrot.slane %v1296_v38, %v540_v61 }
  0xd9   :  { %v1298_v39 = vpop.xlane.xlu1 %432 }
  0xda   :  { %v1300_v40 = vpop.xlane.xlu0 %352  ;;  %v654_v21 = vrot.slane %v1298_v39, %v545_v62 }
  0xdb   :  { %v546_v26 = vrot.slane %v1300_v40, %v545_v62  ;;  %v1379_v40 = vsub.s32 %v633_v20, %v1152_v1 }
  0xdc   :  { %v655_v37 = vsel %vm547_vm1, %v654_v21, %v650_v30 }
  0xdd   :  { %v1302_v41 = vpop.xlane.xlu1 %437  ;;  %v548_v38 = vsel %vm547_vm1, %v546_v26, %v541_v34 }
  0xde   :  { %v1304_v42 = vpop.xlane.xlu0 %357  ;;  %v659_v27 = vrot.slane %v1302_v41, %v552_v4 }
  0xdf   :  { %v553_v31 = vrot.slane %v1304_v42, %v552_v4 }
  0xe1   :  { %v1306_v43 = vpop.xlane.xlu1 %442  ;;  %v555_v58 = vsel %vm554_vm2, %v553_v31, %v548_v38 }
  0xe2   :  { %v1308_v44 = vpop.xlane.xlu0 %362  ;;  %v664_v32 = vrot.slane %v1306_v43, %v559_v5 }
  0xe3   :  { %v560_v35 = vrot.slane %v1308_v44, %v559_v5  ;;  %v660_v44 = vsel %vm554_vm2, %v659_v27, %v655_v37 }
  0xe5   :  { %v1310_v45 = vpop.xlane.xlu1 %447  ;;  %v562_v1 = vsel %vm561_vm3, %v560_v35, %v555_v58  ;;  %v194_v35 = vld [vmem:[#allocation8] sm:$0x3] }
  0xe6   :  { %v1312_v46 = vpop.xlane.xlu0 %367  ;;  %v669_v36 = vrot.slane %v1310_v45, %v566_v11 }
  0xe7   :  { %v567_v41 = vrot.slane %v1312_v46, %v566_v11  ;;  %v665_v46 = vsel %vm561_vm3, %v664_v32, %v660_v44 }
  0xe8   :  { %v670_v61 = vsel %vm568_vm4, %v669_v36, %v665_v46 }
  0xe9   :  { %v1314_v47 = vpop.xlane.xlu1 %452 }
  0xea   :  { %v1316_v48 = vpop.xlane.xlu0 %372  ;;  %v674_v42 = vrot.slane %v1314_v47, %v573_v14 }
  0xeb   :  { %v574_v45 = vrot.slane %v1316_v48, %v573_v14 }
  0xec   :  { %v675_v63 = vsel %vm575_vm5, %v674_v42, %v670_v61 }
  0xed   :  { %v1318_v49 = vpop.xlane.xlu1 %457 }
  0xee   :  { %v1320_v50 = vpop.xlane.xlu0 %377  ;;  %v679_v56 = vrot.slane %v1318_v49, %v580_v17  ;;  %v569_v49 = vsel %vm568_vm4, %v567_v41, %v562_v1 }
  0xef   :  { %v581_v47 = vrot.slane %v1320_v50, %v580_v17  ;;  %v576_v0 = vsel %vm575_vm5, %v574_v45, %v569_v49 }
  0xf0   :  { %v680_v2 = vsel %vm582_vm6, %v679_v56, %v675_v63 }
  0xf1   :  { %v1322_v51 = vpop.xlane.xlu1 %462  ;;  %v583_v4 = vsel %vm582_vm6, %v581_v47, %v576_v0 }
  0xf2   :  { %v1324_v52 = vpop.xlane.xlu0 %382  ;;  %v684_v59 = vrot.slane %v1322_v51, %v587_v18 }
  0xf3   :  { %v588_v62 = vrot.slane %v1324_v52, %v587_v18 }
  0xf4   :  { %v685_v5 = vsel %vm589_vm7, %v684_v59, %v680_v2 }
  0xf5   :  { %v1326_v53 = vpop.xlane.xlu1 %467  ;;  %v590_v6 = vsel %vm589_vm7, %v588_v62, %v583_v4 }
  0xf6   :  { %v1329_v55 = vpop.xlane.xlu0 %387  ;;  %v689_v48 = vrot.slane %v1326_v53, %v1348_v15 }
  0xf7   :  { %v595_v13 = vrot.slane %v1329_v55, %v1348_v15 }
  0xf8   :  { %v690_v7 = vsel %vm596_vm8, %v689_v48, %v685_v5 }
  0xf9   :  { %v1331_v57 = vpop.xlane.xlu1 %472  ;;  %v597_v10 = vsel %vm596_vm8, %v595_v13, %v590_v6 }
  0xfa   :  { %v1333_v60 = vpop.xlane.xlu0 %392  ;;  %v694_v50 = vrot.slane %v1331_v57, %v1354_v22 }
  0xfb   :  { %v602_v52 = vrot.slane %v1333_v60, %v1354_v22 }
  0xfc   :  { %v695_v11 = vsel %vm603_vm9, %v694_v50, %v690_v7 }
  0xfd   :  { %v1337_v3 = vpop.xlane.xlu1 %477  ;;  %v604_v17 = vsel %vm603_vm9, %v602_v52, %v597_v10 }
  0xfe   :  { %v1341_v8 = vpop.xlane.xlu0 %397  ;;  %v699_v53 = vrot.slane %v1337_v3, %v1357_v23 }
  0xff   :  { %v609_v55 = vrot.slane %v1341_v8, %v1357_v23 }
 0x100   :  { %v700_v18 = vsel %vm610_vm10, %v699_v53, %v695_v11 }
 0x101   :  { %v1350_v19 = vpop.xlane.xlu1 %482  ;;  %v611_v20 = vsel %vm610_vm10, %v609_v55, %v604_v17 }
 0x102   :  { %v1359_v24 = vpop.xlane.xlu0 %402  ;;  %v704_v57 = vrot.slane %v1350_v19, %v1364_v28 }
 0x103   :  { %v616_v60 = vrot.slane %v1359_v24, %v1364_v28 }
 0x104   :  { %v705_v21 = vsel %vm617_vm11, %v704_v57, %v700_v18 }
 0x105   :  { %v488_v39 = vpop.xlane.xlu1 %487  ;;  %v618_v23 = vsel %vm617_vm11, %v616_v60, %v611_v20 }
 0x106   :  { %v408_v43 = vpop.xlane.xlu0 %407  ;;  %v709_v9 = vrot.slane %v488_v39, %v1367_v29 }
 0x107   :  { %v623_v14 = vrot.slane %v408_v43, %v1367_v29 }
 0x108   :  { %v710_v24 = vsel %vm624_vm12, %v709_v9, %v705_v21 }
 0x109   :  { %v493_v12 = vpop.xlane.xlu1 %492  ;;  %v625_v26 = vsel %vm624_vm12, %v623_v14, %v618_v23 }
 0x10a   :  { %v413_v51 = vpop.xlane.xlu0 %412  ;;  %v714_v8 = vrot.slane %v493_v12, %v1373_v33 }
 0x10b   :  { %v630_v15 = vrot.slane %v413_v51, %v1373_v33 }
 0x10c   :  { %v715_v27 = vsel %vm631_vm13, %v714_v8, %v710_v24 }
 0x10d   :  { %v498_v3 = vpop.xlane.xlu1 %497  ;;  %v632_v30 = vsel %vm631_vm13, %v630_v15, %v625_v26 }
 0x10e   :  { %v418_v16 = vpop.xlane.xlu0 %417  ;;  %v719_v19 = vrot.slane %v498_v3, %v1379_v40 }
 0x10f   :  { %v637_v22 = vrot.slane %v418_v16, %v1379_v40 }
 0x110   :  { %v720_v31 = vsel %vm638_vm14, %v719_v19, %v715_v27 }
 0x111   :  { %v503_v25 = vpop.xlane.xlu1 %502  ;;  %v639_v33 = vsel %vm638_vm14, %v637_v22, %v632_v30 }
 0x112   :  { %v724_v28 = vrot.slane %v503_v25, %v1385_v54  ;;  %v423_v29 = vpop.xlane.xlu0 %422 }
 0x113   :  { %v644_v32 = vrot.slane %v423_v29, %v1385_v54 }
 0x114   :  { %v725_v34 = vsel %vm645_vm15, %v724_v28, %v720_v31 }
 0x115   :  { %v646_v36 = vsel %vm645_vm15, %v644_v32, %v639_v33 }
 0x116   :  { %v727_v39 = vsel %vm726_vm0, %v725_v34, %v646_v36 }
 0x117   :  { %v729_v40 = vadd.f32 %v727_v39, %v194_v35 }
 0x119   :  { %730 = vst [vmem:[#allocation8] sm:$0x3] %v729_v40 }
 0x120   :  { %v734_v37 = vld [vmem:[#allocation8] sm:$0x3] }
 0x121   :  { %910 = vmatmul.mubr.f32.vlgmr.msra.gmra.mrb[0].mxu0 %v734_v37 }
 0x122   :  { %1025 = shalt.err (!%p1022_p0)
}
 0x123   :  { %s1026_s10 = scalar_lea.hbm %s1472_s4, 32 }
 0x124   :  { %p1027_p1 = scmp.ne.s32.totalorder %s1472_s4, %s1026_s10  ;;  %p1030_p2 = scmp.lt.u32.totalorder %s1026_s10, %s1472_s4 }
 0x126   :  { %p1032_p3 = pnand %p1030_p2, %p1027_p1 }
 0x128   :  { %1035 = shalt.err (!%p1032_p3)
}
 0x129   :  { %838 = dma.vmem_to_hbm [thread:$0]  %s836_s6, 32, %s1472_s4, [#allocation4]   ;;  %v859_v41 = vld [vmem:[%s1471_s3] ss:$0 sm:$0xff] }
 0x12a   :  { %s1077_s18 = smov [#allocation9]  }
 0x12b   :  { %s845_s19 = sshll.u32 %s1077_s18, 4  ;;  %s846_s19 = int_to_ptr.vmem [resolvable:$true] %s845_s19 }
 0x12c   :  { %s1036_s20 = scalar_lea.vmem %s846_s19, 32  ;;  %p1041_p5 = scmp.lt.s32.totalorder %s846_s19, %s846_s19 }
 0x12d   :  { %p1037_p4 = scmp.ne.s32.totalorder %s846_s19, %s1036_s20  ;;  %p1042_p6 = scmp.lt.s32.totalorder %s1036_s20, %s1036_s20 }
 0x12f   :  { %p1043_p7 = por %p1042_p6, %p1041_p5 }
 0x131   :  { %p1044_p8 = pnand %p1043_p7, %p1037_p4 }
 0x1f4   :  { %v824_v42 = vpop.f32.mrb[0].mxu0 }
 0x1f5   :  { %v825_v43 = vadd.f32 %v859_v41, %v824_v42  ;;  %v911_v54 = vpop.f32.mrb[1].mxu0 }
 0x1f7   :  { %828 = vst [vmem:[#allocation9] sm:$0x3] %v825_v43 }
 0x1f8   :  { %1047 = shalt.err (!%p1044_p8)
}
 0x1f9   :  { %s1048_s23 = scalar_lea.hbm %s1473_s5, 32 }
 0x1fa   :  { %p1049_p9 = scmp.ne.s32.totalorder %s1473_s5, %s1048_s23  ;;  %p1052_p10 = scmp.lt.u32.totalorder %s1048_s23, %s1473_s5 }
 0x1fc   :  { %p1054_p11 = pnand %p1052_p10, %p1049_p9 }
 0x1fe   :  { %1057 = shalt.err (!%p1054_p11)
}
 0x1ff   :  { %848 = dma.vmem_to_hbm [thread:$0]  %s846_s19, 32, %s1473_s5, [#allocation10]  }
 0x200   :  { %1062 = dma.done.wait [#allocation4], 32  }
 0x201   :  { %1063 = vsyncadd [#allocation4], 4294967264 }
 0x202   :  { %1064 = dma.done.wait [#allocation10], 32  }
 0x203   :  { %1065 = vsyncadd [#allocation10], 4294967264 }
 0x204   :  { %855 = vsyncpa [#allocation3], 1 }
 0x205   :  { %856 = vsyncpa [#allocation6], 1 }
 0x206   :  { %857 = vsyncpa [#allocation4], 1 }
 0x207   :  { %858 = vsyncpa [#allocation10], 1 }

</bundles_post_ra>
